<compile_context>
chip_gen: v5e
topology: v5e:2x2
jax: 0.10.0
libtpu: 0.0.40
codegen_flags: <defaults>
</compile_context>

<pallas_src>
import jax
import jax.numpy as jnp
from jax.experimental import pallas as pl
from jax.experimental.pallas import tpu as pltpu

_LANE = 128
# Per-channel-plane byte budget for one block in the lane-dense (fast) path.
# Folded channel (x3) and double-buffered in+out (x4) => ~24 MiB live VMEM.
_PLANE_BYTES = 2 * 1024 * 1024
# In the ragged path the 3-row channel axis is sublane-padded to 8 in VMEM, so
# budget the *padded* per-buffer footprint instead (4 buffers x 6 MiB = 24 MiB).
_RAGGED_VMEM_BYTES = 6 * 1024 * 1024


def _cdiv(a, b):
    return -(-a // b)


def _round_up(a, m):
    return _cdiv(a, m) * m


def _pick_tile(total, max_tile, mult, want_tiles):
    """Balanced tile along one axis: tile is either == total or a multiple of `mult`."""
    n = max(want_tiles, _cdiv(total, max_tile))
    if n <= 1 or total <= mult:
        return total, 1
    tile = _round_up(_cdiv(total, n), mult)
    n_tiles = _cdiv(total, tile)
    if n_tiles <= 1:
        return total, 1
    return tile, n_tiles


def _colorcal_kernel(camidx_ref, ididx_ref,            # scalar-prefetch (SMEM)
                     wcam_ref, bcam_ref,               # SMEM param tables (ncams, 3)
                     wident_ref, bident_ref,           # SMEM param tables (nident, 3)
                     img_ref,                          # VMEM (1, 3, TR, 128) or (1, 3, TP)
                     out_ref):                         # VMEM, same block shape
    b = pl.program_id(0)
    cam = camidx_ref[b]
    idt = ididx_ref[b]
    # Static 3-channel unroll: one whole-plane FMA per channel on the VPU,
    # with the per-channel scale/offset gathered as scalars from SMEM.
    for c in range(3):
        w = wcam_ref[cam, c] + wident_ref[idt, c]
        off = bcam_ref[cam, c] + bident_ref[idt, c]
        out_ref[:, c] = (img_ref[:, c] * w + off).astype(out_ref.dtype)


def colorcal_forward(image, camindex, idindex, wcam, bcam, wident, bident,
                     *, donate_image=False):
    """image: (B, 3, H, W); camindex/idindex: (B,) ints; params: (n, 3) f32."""
    B, C, H, W = image.shape
    assert C == 3
    P = H * W
    itemsize = jnp.dtype(image.dtype).itemsize
    sub = max(8, 8 * (4 // itemsize))      # sublane packing: f32->8, bf16->16, int8->32
    out_dtype = jnp.result_type(image.dtype, wcam.dtype)

    # Scalar prefetch requires int32 indices (defensive cast against x64 inputs).
    camindex = jnp.asarray(camindex, jnp.int32)
    idindex = jnp.asarray(idindex, jnp.int32)

    # Keep at least 2 parallel grid steps so v7x's second TensorCore has work.
    want_tiles = 1 if B >= 2 else 2

    if P % _LANE == 0:
        # Fast path: free reshape to lane-dense (B, 3, R, 128); no sublane waste,
        # unmasked 128-wide stores.
        R = P // _LANE
        img = image.reshape(B, C, R, _LANE)
        tr_max = max(sub, _PLANE_BYTES // (_LANE * itemsize))
        tile, n_tiles = _pick_tile(R, tr_max, sub, want_tiles)
        blk = pl.BlockSpec((1, C, tile, _LANE), lambda b, t, cam, idt: (b, 0, t, 0))
        out_shape = jax.ShapeDtypeStruct((B, C, R, _LANE), out_dtype)
    else:
        # Ragged path: keep the flat (B, 3, P) view (free reshape).  The last
        # block along P is clipped by Pallas (OOB reads undefined, OOB writes
        # dropped), so there are no extra pad/slice passes over HBM.
        img = image.reshape(B, C, P)
        tp_max = max(_LANE, (_RAGGED_VMEM_BYTES // (8 * itemsize)) // _LANE * _LANE)
        tile, n_tiles = _pick_tile(P, tp_max, _LANE, want_tiles)
        blk = pl.BlockSpec((1, C, tile), lambda b, t, cam, idt: (b, 0, t))
        out_shape = jax.ShapeDtypeStruct((B, C, P), out_dtype)

    smem = pl.BlockSpec(memory_space=pltpu.SMEM)
    grid_spec = pltpu.PrefetchScalarGridSpec(
        num_scalar_prefetch=2,
        grid=(B, n_tiles),
        in_specs=[smem, smem, smem, smem, blk],
        out_specs=blk,
    )

    io_alias = {}
    if donate_image and out_dtype == image.dtype:
        io_alias = {6: 0}   # image (7th pallas_call operand) -> output 0

    bytes_accessed = (B * C * P * itemsize                       # image read
                      + B * C * P * jnp.dtype(out_dtype).itemsize  # output write
                      + (wcam.size + bcam.size + wident.size + bident.size) * 4
                      + 2 * B * 4)
    cost = pl.CostEstimate(flops=2 * B * C * P, transcendentals=0,
                           bytes_accessed=bytes_accessed)

    out = pl.pallas_call(
        _colorcal_kernel,
        out_shape=out_shape,
        grid_spec=grid_spec,
        compiler_params=pltpu.CompilerParams(
            dimension_semantics=("parallel", "parallel"),
            vmem_limit_bytes=32 * 1024 * 1024,
        ),
        cost_estimate=cost,
        input_output_aliases=io_alias,
    )(camindex, idindex, wcam, bcam, wident, bident, img)

    return out.reshape(B, C, H, W)


def colorcal_reference(image, camindex, idindex, wcam, bcam, wident, bident):
    w = wcam[camindex] + wident[idindex]        # (B, 3)
    b = bcam[camindex] + bident[idindex]        # (B, 3)
    return w[:, :, None, None] * image + b[:, :, None, None]


if __name__ == "__main__":
    ncams, nident = 4, 5
    key = jax.random.PRNGKey(0)
    k_wc, k_bc, k_wi, k_bi, k_img1, k_img2, k_cam, k_id = jax.random.split(key, 8)

    # Module __init__ values (wcam ones, rest zeros), perturbed so the affine
    # transform is non-trivial.
    wcam = jnp.ones((ncams, 3), jnp.float32) + 0.1 * jax.random.normal(k_wc, (ncams, 3))
    bcam = jnp.zeros((ncams, 3), jnp.float32) + 0.1 * jax.random.normal(k_bc, (ncams, 3))
    wident = jnp.zeros((nident, 3), jnp.float32) + 0.1 * jax.random.normal(k_wi, (nident, 3))
    bident = jnp.zeros((nident, 3), jnp.float32) + 0.1 * jax.random.normal(k_bi, (nident, 3))

    B = 2
    camindex = jax.random.randint(k_cam, (B,), 0, ncams, dtype=jnp.int32)
    idindex = jax.random.randint(k_id, (B,), 0, nident, dtype=jnp.int32)

    # Case 1: H*W % 128 == 0 (lane-dense fast path).
    img_a = jax.random.normal(k_img1, (B, 3, 16, 16), dtype=jnp.float32)
    out_a = jax.block_until_ready(
        colorcal_forward(img_a, camindex, idindex, wcam, bcam, wident, bident))
    ref_a = colorcal_reference(img_a, camindex, idindex, wcam, bcam, wident, bident)
    assert out_a.shape == ref_a.shape and out_a.dtype == ref_a.dtype
    assert jnp.allclose(out_a, ref_a, atol=1e-5, rtol=1e-5)

    # Case 2: H*W % 128 != 0 (ragged tail handled in-kernel, no pad/slice).
    img_b = jax.random.normal(k_img2, (B, 3, 11, 13), dtype=jnp.float32)
    out_b = jax.block_until_ready(
        colorcal_forward(img_b, camindex, idindex, wcam, bcam, wident, bident))
    ref_b = colorcal_reference(img_b, camindex, idindex, wcam, bcam, wident, bident)
    assert out_b.shape == ref_b.shape and out_b.dtype == ref_b.dtype
    assert jnp.allclose(out_b, ref_b, atol=1e-5, rtol=1e-5)

    print("KERNEL_OK")
</pallas_src>

<mosaic_0001>
module attributes {stable_mosaic.version = 11 : i64} {
  func.func @_colorcal_kernel(%arg0: i32, %arg1: i32, %arg2: memref<2xi32, #tpu.memory_space<smem>>, %arg3: memref<2xi32, #tpu.memory_space<smem>>, %arg4: memref<4x3xf32, #tpu.memory_space<smem>>, %arg5: memref<4x3xf32, #tpu.memory_space<smem>>, %arg6: memref<5x3xf32, #tpu.memory_space<smem>>, %arg7: memref<5x3xf32, #tpu.memory_space<smem>>, %arg8: memref<1x3x2x128xf32, #tpu.memory_space<vmem>>, %arg9: memref<1x3x2x128xf32, #tpu.memory_space<vmem>>) attributes {dimension_semantics = [#tpu.dimension_semantics<parallel>, #tpu.dimension_semantics<parallel>], iteration_bounds = array<i64: 2, 1>, scalar_prefetch = 2 : i64, scratch_operands = 0 : i64, tpu.core_type = #tpu.core_type<tc>, window_params = [{transform_indices = @transform_0, window_bounds = array<i64: 4, 3>}, {transform_indices = @transform_1, window_bounds = array<i64: 4, 3>}, {transform_indices = @transform_2, window_bounds = array<i64: 5, 3>}, {transform_indices = @transform_3, window_bounds = array<i64: 5, 3>}, {transform_indices = @transform_4, window_bounds = array<i64: 1, 3, 2, 128>}, {transform_indices = @transform_5, window_bounds = array<i64: 1, 3, 2, 128>}]} {
    %0 = arith.index_cast %arg0 : i32 to index
    %1 = memref.load %arg2[%0] : memref<2xi32, #tpu.memory_space<smem>>
    %2 = arith.index_cast %arg0 : i32 to index
    %3 = memref.load %arg3[%2] : memref<2xi32, #tpu.memory_space<smem>>
    %4 = arith.index_cast %1 : i32 to index
    %c0 = arith.constant 0 : index
    %5 = memref.load %arg4[%4, %c0] : memref<4x3xf32, #tpu.memory_space<smem>>
    %6 = arith.index_cast %3 : i32 to index
    %c0_0 = arith.constant 0 : index
    %7 = memref.load %arg6[%6, %c0_0] : memref<5x3xf32, #tpu.memory_space<smem>>
    %8 = arith.addf %5, %7 : f32
    %9 = arith.index_cast %1 : i32 to index
    %c0_1 = arith.constant 0 : index
    %10 = memref.load %arg5[%9, %c0_1] : memref<4x3xf32, #tpu.memory_space<smem>>
    %11 = arith.index_cast %3 : i32 to index
    %c0_2 = arith.constant 0 : index
    %12 = memref.load %arg7[%11, %c0_2] : memref<5x3xf32, #tpu.memory_space<smem>>
    %13 = arith.addf %10, %12 : f32
    %c0_3 = arith.constant 0 : index
    %c0_4 = arith.constant 0 : index
    %c0_5 = arith.constant 0 : index
    %c0_6 = arith.constant 0 : index
    %14 = vector.load %arg8[%c0_3, %c0_4, %c0_5, %c0_6] : memref<1x3x2x128xf32, #tpu.memory_space<vmem>>, vector<1x1x2x128xf32>
    %15 = vector.shape_cast %14 : vector<1x1x2x128xf32> to vector<1x2x128xf32>
    %16 = vector.broadcast %8 : f32 to vector<1x2x128xf32>
    %17 = arith.mulf %15, %16 : vector<1x2x128xf32>
    %18 = vector.broadcast %13 : f32 to vector<1x2x128xf32>
    %19 = arith.addf %17, %18 : vector<1x2x128xf32>
    %c0_7 = arith.constant 0 : index
    %c0_8 = arith.constant 0 : index
    %c0_9 = arith.constant 0 : index
    %c0_10 = arith.constant 0 : index
    %20 = vector.load %arg9[%c0_7, %c0_8, %c0_9, %c0_10] : memref<1x3x2x128xf32, #tpu.memory_space<vmem>>, vector<1x1x2x128xf32>
    %21 = vector.shape_cast %20 : vector<1x1x2x128xf32> to vector<1x2x128xf32>
    %22 = vector.shape_cast %19 : vector<1x2x128xf32> to vector<1x1x2x128xf32>
    tpu.vector_store %arg9[%c0_7, %c0_8, %c0_9, %c0_10], %22 {strides = array<i32>} : memref<1x3x2x128xf32, #tpu.memory_space<vmem>>, vector<1x1x2x128xf32>,
    %23 = arith.index_cast %1 : i32 to index
    %c1 = arith.constant 1 : index
    %24 = memref.load %arg4[%23, %c1] : memref<4x3xf32, #tpu.memory_space<smem>>
    %25 = arith.index_cast %3 : i32 to index
    %c1_11 = arith.constant 1 : index
    %26 = memref.load %arg6[%25, %c1_11] : memref<5x3xf32, #tpu.memory_space<smem>>
    %27 = arith.addf %24, %26 : f32
    %28 = arith.index_cast %1 : i32 to index
    %c1_12 = arith.constant 1 : index
    %29 = memref.load %arg5[%28, %c1_12] : memref<4x3xf32, #tpu.memory_space<smem>>
    %30 = arith.index_cast %3 : i32 to index
    %c1_13 = arith.constant 1 : index
    %31 = memref.load %arg7[%30, %c1_13] : memref<5x3xf32, #tpu.memory_space<smem>>
    %32 = arith.addf %29, %31 : f32
    %c0_14 = arith.constant 0 : index
    %c1_15 = arith.constant 1 : index
    %c0_16 = arith.constant 0 : index
    %c0_17 = arith.constant 0 : index
    %33 = vector.load %arg8[%c0_14, %c1_15, %c0_16, %c0_17] : memref<1x3x2x128xf32, #tpu.memory_space<vmem>>, vector<1x1x2x128xf32>
    %34 = vector.shape_cast %33 : vector<1x1x2x128xf32> to vector<1x2x128xf32>
    %35 = vector.broadcast %27 : f32 to vector<1x2x128xf32>
    %36 = arith.mulf %34, %35 : vector<1x2x128xf32>
    %37 = vector.broadcast %32 : f32 to vector<1x2x128xf32>
    %38 = arith.addf %36, %37 : vector<1x2x128xf32>
    %c0_18 = arith.constant 0 : index
    %c1_19 = arith.constant 1 : index
    %c0_20 = arith.constant 0 : index
    %c0_21 = arith.constant 0 : index
    %39 = vector.load %arg9[%c0_18, %c1_19, %c0_20, %c0_21] : memref<1x3x2x128xf32, #tpu.memory_space<vmem>>, vector<1x1x2x128xf32>
    %40 = vector.shape_cast %39 : vector<1x1x2x128xf32> to vector<1x2x128xf32>
    %41 = vector.shape_cast %38 : vector<1x2x128xf32> to vector<1x1x2x128xf32>
    tpu.vector_store %arg9[%c0_18, %c1_19, %c0_20, %c0_21], %41 {strides = array<i32>} : memref<1x3x2x128xf32, #tpu.memory_space<vmem>>, vector<1x1x2x128xf32>,
    %42 = arith.index_cast %1 : i32 to index
    %c2 = arith.constant 2 : index
    %43 = memref.load %arg4[%42, %c2] : memref<4x3xf32, #tpu.memory_space<smem>>
    %44 = arith.index_cast %3 : i32 to index
    %c2_22 = arith.constant 2 : index
    %45 = memref.load %arg6[%44, %c2_22] : memref<5x3xf32, #tpu.memory_space<smem>>
    %46 = arith.addf %43, %45 : f32
    %47 = arith.index_cast %1 : i32 to index
    %c2_23 = arith.constant 2 : index
    %48 = memref.load %arg5[%47, %c2_23] : memref<4x3xf32, #tpu.memory_space<smem>>
    %49 = arith.index_cast %3 : i32 to index
    %c2_24 = arith.constant 2 : index
    %50 = memref.load %arg7[%49, %c2_24] : memref<5x3xf32, #tpu.memory_space<smem>>
    %51 = arith.addf %48, %50 : f32
    %c0_25 = arith.constant 0 : index
    %c2_26 = arith.constant 2 : index
    %c0_27 = arith.constant 0 : index
    %c0_28 = arith.constant 0 : index
    %52 = vector.load %arg8[%c0_25, %c2_26, %c0_27, %c0_28] : memref<1x3x2x128xf32, #tpu.memory_space<vmem>>, vector<1x1x2x128xf32>
    %53 = vector.shape_cast %52 : vector<1x1x2x128xf32> to vector<1x2x128xf32>
    %54 = vector.broadcast %46 : f32 to vector<1x2x128xf32>
    %55 = arith.mulf %53, %54 : vector<1x2x128xf32>
    %56 = vector.broadcast %51 : f32 to vector<1x2x128xf32>
    %57 = arith.addf %55, %56 : vector<1x2x128xf32>
    %c0_29 = arith.constant 0 : index
    %c2_30 = arith.constant 2 : index
    %c0_31 = arith.constant 0 : index
    %c0_32 = arith.constant 0 : index
    %58 = vector.load %arg9[%c0_29, %c2_30, %c0_31, %c0_32] : memref<1x3x2x128xf32, #tpu.memory_space<vmem>>, vector<1x1x2x128xf32>
    %59 = vector.shape_cast %58 : vector<1x1x2x128xf32> to vector<1x2x128xf32>
    %60 = vector.shape_cast %57 : vector<1x2x128xf32> to vector<1x1x2x128xf32>
    tpu.vector_store %arg9[%c0_29, %c2_30, %c0_31, %c0_32], %60 {strides = array<i32>} : memref<1x3x2x128xf32, #tpu.memory_space<vmem>>, vector<1x1x2x128xf32>,
    return
  }
  func.func @transform_0(%arg0: i32, %arg1: i32, %arg2: memref<2xi32, #tpu.memory_space<smem>>, %arg3: memref<2xi32, #tpu.memory_space<smem>>) -> (i32, i32) {
    %c0_i32 = arith.constant 0 : i32
    %c0_i32_0 = arith.constant 0 : i32
    %c0_i32_1 = arith.constant 0 : i32
    return %c0_i32, %c0_i32_0 : i32, i32
  }
  func.func @transform_1(%arg0: i32, %arg1: i32, %arg2: memref<2xi32, #tpu.memory_space<smem>>, %arg3: memref<2xi32, #tpu.memory_space<smem>>) -> (i32, i32) {
    %c0_i32 = arith.constant 0 : i32
    %c0_i32_0 = arith.constant 0 : i32
    %c0_i32_1 = arith.constant 0 : i32
    return %c0_i32, %c0_i32_0 : i32, i32
  }
  func.func @transform_2(%arg0: i32, %arg1: i32, %arg2: memref<2xi32, #tpu.memory_space<smem>>, %arg3: memref<2xi32, #tpu.memory_space<smem>>) -> (i32, i32) {
    %c0_i32 = arith.constant 0 : i32
    %c0_i32_0 = arith.constant 0 : i32
    %c0_i32_1 = arith.constant 0 : i32
    return %c0_i32, %c0_i32_0 : i32, i32
  }
  func.func @transform_3(%arg0: i32, %arg1: i32, %arg2: memref<2xi32, #tpu.memory_space<smem>>, %arg3: memref<2xi32, #tpu.memory_space<smem>>) -> (i32, i32) {
    %c0_i32 = arith.constant 0 : i32
    %c0_i32_0 = arith.constant 0 : i32
    %c0_i32_1 = arith.constant 0 : i32
    return %c0_i32, %c0_i32_0 : i32, i32
  }
  func.func @transform_4(%arg0: i32, %arg1: i32, %arg2: memref<2xi32, #tpu.memory_space<smem>>, %arg3: memref<2xi32, #tpu.memory_space<smem>>) -> (i32, i32, i32, i32) {
    %c0_i32 = arith.constant 0 : i32
    %c0_i32_0 = arith.constant 0 : i32
    %c0_i32_1 = arith.constant 0 : i32
    return %arg0, %c0_i32, %arg1, %c0_i32_0 : i32, i32, i32, i32
  }
  func.func @transform_5(%arg0: i32, %arg1: i32, %arg2: memref<2xi32, #tpu.memory_space<smem>>, %arg3: memref<2xi32, #tpu.memory_space<smem>>) -> (i32, i32, i32, i32) {
    %c0_i32 = arith.constant 0 : i32
    %c0_i32_0 = arith.constant 0 : i32
    %c0_i32_1 = arith.constant 0 : i32
    return %arg0, %c0_i32, %arg1, %c0_i32_0 : i32, i32, i32, i32
  }
}

</mosaic_0001>

<bundles_post_ra>
// kernel: tpu_custom_call.1
= control target key start
LH: loop header
LB: loop body
LE: loop exit
PB: predicated region body
PF: predicated region fallthrough
CT: control target
= control target key end

     0   :  { %s803_s30 = smov [#allocation3]   ;;  %s804_s8 = smov [#allocation4]   ;;  %s1015_s0 = inlined_call_operand.hbm [shape: s32[2], index: 0, kind: input, shape index: {}]   ;;  %s1016_s2 = inlined_call_operand.vmem [shape: f32[4,3], index: 2, kind: input, shape index: {}]   ;;  %s1017_s3 = inlined_call_operand.vmem [shape: f32[4,3], index: 3, kind: input, shape index: {}]   ;;  %s1018_s4 = inlined_call_operand.vmem [shape: f32[5,3], index: 4, kind: input, shape index: {}]   ;;  %s1019_s5 = inlined_call_operand.vmem [shape: f32[5,3], index: 5, kind: input, shape index: {}]   ;;  %s1020_s6 = inlined_call_operand.vmem [shape: f32[2,3,2,128], index: 6, kind: input, shape index: {}]   ;;  %s1021_s7 = inlined_call_operand.hbm [shape: f32[2,3,2,128], index: 7, kind: output, shape index: {}]   ;;  %s1022_s1 = inlined_call_operand.hbm [shape: s32[2], index: 1, kind: input, shape index: {}]  }
   0x1   :  { %1026 = sst [smem:[#allocation23_spill]] %s1016_s2  ;;  %s13_s26 = sshll.u32 %s1015_s0, 4  ;;  %s14_s26 = int_to_ptr.hbm [resolvable:$true] %s13_s26 }
   0x2   :  { %1027 = sst [smem:[#allocation24_spill]] %s1017_s3  ;;  %s18_s29 = sshll.u32 %s1022_s1, 4  ;;  %s19_s29 = int_to_ptr.hbm [resolvable:$true] %s18_s29 }
   0x3   :  { %1028 = sst [smem:[#allocation25_spill]] %s1018_s4 }
   0x4   :  { %1029 = sst [smem:[#allocation26_spill]] %s1019_s5 }
   0x5   :  { %16 = dma.hbm_to_smem %s14_s26, 16, %s803_s30, [#allocation2] }
   0x6   :  { %21 = dma.hbm_to_smem %s19_s29, 16, %s804_s8, [#allocation2] }
   0x7   :  { %761 = dma.done.wait [#allocation2], 32 }
   0x8   :  { %762 = vsyncadd [#allocation2], 4294967264 }
   0x9   :  { %24 = sfence }
   0xa   :  { %25 = vsyncpa [#allocation7], 0 }
   0xb   :  { %26 = vsyncpa [#allocation9], 0 }
   0xc   :  { %27 = vsyncpa [#allocation12], 0 }
   0xd   :  { %28 = vsyncpa [#allocation6], 0 }
   0xe   :  { %30 = vsyncpa [#allocation6 + $0x1], 0  ;;  %s857_s9 = smov 0   ;;  %s859_s0 = smov 0  }
   0xf   :  { %s861_s10 = smov 0   ;;  %s863_s1 = smov 0  }
  0x10   :  { %s865_s11 = smov 0   ;;  %s867_s12 = smov 0  }
  0x11 LB: > { %1030 = sst [smem:[#allocation19_spill]] %s789_s10  ;;  %s499_s13 = sadd.s32 4294967295, %s801_s12   ;;  %s801_s12 = sphi %s867_s12, %s36_s12   ;;  %s797_s11 = sphi %s865_s11, %s1045_s11   ;;  %s793_s1 = sphi %s863_s1, %s1044_s1   ;;  %s789_s10 = sphi %s861_s10, %s1043_s10   ;;  %s785_s0 = sphi %s859_s0, %s1047_s0   ;;  %s781_s9 = sphi %s857_s9, %s1046_s9  }
  0x12   : > { %1031 = sst [smem:[#allocation20_spill]] %s797_s11  ;;  %s500_s14 = sadd.s32 4294967294, %s801_s12  }
  0x13   : > { %s48_s15 = sadd.s32 1, %s797_s11  ;;  %s169_s16 = sadd.s32 1, %s789_s10 }
  0x14   : > { %p50_p0 = scmp.ge.s32.totalorder %s48_s15, 2  ;;  %p179_p1 = scmp.ne.s32.totalorder %s789_s10, %s785_s0 }
  0x15   : > { %p180_p2 = scmp.eq.s32.totalorder %s499_s13, 1  ;;  %p185_p3 = scmp.ne.s32.totalorder %s785_s0, %s781_s9 }
  0x16   : > { %s1049_s15 = smov (%p50_p0, %s48_s15), 0  ;;  %p186_p5 = scmp.eq.s32.totalorder %s500_s14, 1 }
  0x17   : > { %1032 = sst [smem:[#allocation21_spill]] %s1049_s15  ;;  %p897_p4 = por %p180_p2, %p179_p1 }
  0x18   : > { %s164_s18 = ssub.s32 %s797_s11, %s1049_s15  ;;  %p501_p6 = scmp.ge.s32.totalorder %s801_s12, 1 }
  0x19   : > { %p167_p7 = scmp.eq.s32.totalorder %s164_s18, 0  ;;  %p904_p8 = por %p186_p5, %p185_p3 }
  0x1a   : > { %p193_p9 = scmp.lt.s32.totalorder %s801_s12, 3  ;;  %p916_p11 = scmp.eq.s32.totalorder %s499_s13, 0 }
  0x1b   : > { %s910_s20 = scalar_select %p167_p7, %s789_s10, %s169_s16  }
  0x1c   : > { %p912_p10 = pnand %p501_p6, %p193_p9  ;;  %s1038_s3 = sld [smem:[#allocation24_spill]] }
  0x1d   : > { %1035 = sst [smem:[#allocation22_spill]] %s910_s20  ;;  %s805_s13 = smov [#allocation8]  }
  0x1e   : > { %p543_p12 = pneg %p912_p10  ;;  %s1039_s2 = sld [smem:[#allocation23_spill]] }
  0x1f   : > { %s1040_s4 = sld [smem:[#allocation25_spill]]  ;;  %s806_s14 = smov [#allocation5]  }
  0x20   : > { %p544_p13 = pnand %p916_p11, %p543_p12  ;;  %s807_s16 = smov [#allocation10]  }
  0x21   : > { %s1041_s5 = sld [smem:[#allocation26_spill]]  ;;  %s808_s26 = smov [#allocation11]  }
  0x22   : > { %s215_s25 = sshll.u32 %s1038_s3, 4  ;;  %s216_s25 = int_to_ptr.vmem [resolvable:$true] %s215_s25 }
  0x23   : > { %549 = dma.vmem_to_smem (!%p544_p13), %s216_s25, 64, %s805_s13, [#allocation9]  }
  0x24   : > { %s205_s28 = sshll.u32 %s1039_s2, 4  ;;  %s206_s28 = int_to_ptr.vmem [resolvable:$true] %s205_s28 }
  0x25   : > { %s225_s8 = sshll.u32 %s1040_s4, 4  ;;  %259 = sbr.rel (%p912_p10) target bundleno = 86 (0x56), region = 40  ;;  %s226_s8 = int_to_ptr.vmem [resolvable:$true] %s225_s8 }
  0x26   : > { %546 = dma.vmem_to_smem (!%p544_p13), %s206_s28, 64, %s806_s14, [#allocation7]  }
  0x27   : > { %552 = dma.vmem_to_smem (!%p544_p13), %s226_s8, 128, %s807_s16, [#allocation9]  }
  0x28   : > { %s235_s24 = sshll.u32 %s1041_s5, 4  ;;  %s236_s24 = int_to_ptr.vmem [resolvable:$true] %s235_s24 }
  0x29   : > { %555 = dma.vmem_to_smem (!%p544_p13), %s236_s24, 128, %s808_s26, [#allocation12]  }
  0x2a   : > { %764 = dma.done.wait (%p916_p11), [#allocation7], 64  }
  0x2b   : > { %766 = vsyncadd (%p916_p11), [#allocation7], 4294967232 }
  0x2c   : > { %768 = dma.done.wait (%p916_p11), [#allocation9], 192  }
  0x2d   : > { %770 = vsyncadd (%p916_p11), [#allocation9], 4294967104 }
  0x2e   : > { %772 = dma.done.wait (%p916_p11), [#allocation12], 128  }
  0x2f   : > { %774 = vsyncadd (%p916_p11), [#allocation12], 4294967168 }
  0x30   : > { %281 = sfence }
  0x31   : > { %p307_p0 = scmp.lt.s32.totalorder %s793_s1, 1  ;;  %s315_s21 = sld [smem:[#allocation3 + %s793_s1]] }
  0x32   : > { %s316_s27 = sld [smem:[#allocation4 + %s793_s1]]  ;;  %s304_s23 = sand.u32 1, %s785_s0  }
  0x33   : > { %s308_s25 = scalar_select %p307_p0, %s793_s1, 1 }
  0x34   : > { %s522_s5 = smul.u32 6, %s304_s23 }
  0x35   : > { %s523_s28 = smul.u32 6, %s308_s25 }
  0x37   : > { %s954_s29 = sshll.u32 %s315_s21, 7  ;;  %s968_s25 = scalar_lea.vmem %s1020_s6, %s523_s28 }
  0x38   : > { %s318_s22 = sld [smem:[#allocation5 + %s954_s29]]  ;;  %s331_s30 = sadd.s32 1, %s954_s29  ;;  %v325_v0 = vld [vmem:[%s968_s25] sm:$0x3]  ;;  %v515_v4 = vld [vmem:[%s968_s25 + $0x2] sm:$0x3] }
  0x39   : > { %s958_s8 = sshll.u32 %s316_s27, 7  ;;  %s322_s13 = sld [smem:[#allocation8 + %s954_s29]]  ;;  %v517_v10 = vld [vmem:[%s968_s25 + $0x4] sm:$0x3] }
  0x3a   : > { %s320_s14 = sld [smem:[#allocation10 + %s958_s8]]  ;;  %s333_s16 = sadd.s32 1, %s958_s8 }
  0x3b   : > { %s323_s18 = sld [smem:[#allocation11 + %s958_s8]]  ;;  %s347_s4 = sadd.s32 2, %s954_s29 }
  0x3c   : > { %s332_s24 = sld [smem:[#allocation5 + %s331_s30]]  ;;  %s349_s20 = sadd.s32 2, %s958_s8 }
  0x3d   : > { %s334_s2 = sld [smem:[#allocation10 + %s333_s16]] }
  0x3e   : > { %s336_s27 = sld [smem:[#allocation8 + %s331_s30]]  ;;  %s524_s30 = smul.u32 6, %s793_s1 }
  0x3f   : > { %s337_s3 = sld [smem:[#allocation11 + %s333_s16]]  ;;  %s306_s16 = scalar_lea.vmem [#allocation13], %s522_s5 }
  0x40   : > { %s321_s15 = sadd.f32 %s320_s14, %s318_s22 }
  0x41   : > { %s324_s11 = sadd.f32 %s323_s18, %s322_s13  ;;  %s377_s13 = sshll.u32 %s306_s16, 4  ;;  %s378_s13 = int_to_ptr.vmem [resolvable:$true] %s377_s13 }
  0x42   : > { %v326_v1 = vstv %s321_s15  ;;  %s348_s10 = sld [smem:[#allocation5 + %s347_s4]]  ;;  %s729_s18 = scalar_lea.hbm %s1021_s7, 12 }
  0x43   : > { %v327_v2 = vmul.f32 %v326_v1, %v325_v0  ;;  %v328_v3 = vstv %s324_s11  ;;  %s335_s26 = sadd.f32 %s334_s2, %s332_s24  ;;  %s376_s11 = scalar_lea.hbm %s1021_s7, %s524_s30 }
  0x44   : > { %s350_s28 = sld [smem:[#allocation10 + %s349_s20]] }
  0x45   : > { %v329_v5 = vadd.f32 %v328_v3, %v327_v2  ;;  %s338_s21 = sadd.f32 %s337_s3, %s336_s27  ;;  %v341_v6 = vstv %s335_s26  ;;  %s379_s3 = sshll.u32 %s376_s11, 4  ;;  %s380_s3 = int_to_ptr.hbm [resolvable:$true] %s379_s3 }
  0x46   : > { %v342_v7 = vmul.f32 %v515_v4, %v341_v6  ;;  %s352_s29 = sld [smem:[#allocation8 + %s347_s4]]  ;;  %s364_s4 = scalar_lea.sflag [#allocation6], %s304_s23 }
  0x47   : > { %330 = vst [vmem:[%s306_s16] sm:$0x3] %v329_v5  ;;  %v343_v8 = vstv %s338_s21  ;;  %s353_s22 = sld [smem:[#allocation11 + %s349_s20]]  ;;  %s723_s5 = sshra.s32 %s380_s3, 4  ;;  %s724_s5 = int_to_ptr.hbm [resolvable:$true] %s723_s5 }
  0x48   : > { %v344_v9 = vadd.f32 %v343_v8, %v342_v7  ;;  %s725_s20 = scalar_lea.hbm %s724_s5, 6  ;;  %p730_p5 = scmp.lt.s32.totalorder %s724_s5, %s1021_s7 }
  0x49   : > { %p726_p1 = scmp.ne.s32.totalorder %s724_s5, %s725_s20  ;;  %p731_p6 = scmp.lt.s32.totalorder %s729_s18, %s725_s20 }
  0x4a   : > { %516 = vst [vmem:[%s306_s16 + $0x2] sm:$0x3] %v344_v9  ;;  %s351_s2 = sadd.f32 %s350_s28, %s348_s10 }
  0x4b   : > { %p727_p2 = pnand %p726_p1, %p897_p4  ;;  %p732_p7 = por %p731_p6, %p730_p5 }
  0x4c   : > { %v357_v11 = vstv %s351_s2 }
  0x4d   : > { %s354_s1 = sadd.f32 %s353_s22, %s352_s29  ;;  %v358_v12 = vmul.f32 %v517_v10, %v357_v11  ;;  %p728_p3 = pneg %p727_p2 }
  0x4f   : > { %v359_v13 = vstv %s354_s1  ;;  %p733_p9 = pnand %p732_p7, %p728_p3 }
  0x50   : > { %v360_v14 = vadd.f32 %v359_v13, %v358_v12 }
  0x52   : > { %518 = vst [vmem:[%s306_s16 + $0x4] sm:$0x3] %v360_v14 }
  0x53   : > { %736 = shalt.err (!%p733_p9)
}
  0x54   : > { %s809_s23 = smov 32   ;;  %s810_s27 = smov 2  }
  0x55   : > { %541 = dma.vmem_to_hbm [thread:$0]  (%p897_p4), %s378_s13, 96, %s380_s3, %s364_s4, %s809_s23, %s809_s23, %s810_s27  }
  0x56 PF: > { %p568_p10 = scmp.ge.s32.totalorder %s801_s12, 2  ;;  %s394_s26 = sand.u32 1, %s781_s9  }
  0x57   : > { %s395_s28 = scalar_lea.sflag [#allocation6], %s394_s26 }
  0x58   : > { %p557_p11 = pnand %p568_p10, %p904_p8 }
  0x5a   : > { %p558_p12 = pneg %p557_p11 }
  0x5c   : > { %776 = dma.done.wait (%p558_p12), %s395_s28, 96  }
  0x5d   : > { %778 = vsyncadd (%p558_p12), %s395_s28, 4294967200  ;;  %s36_s12 = sadd.s32 1, %s801_s12   ;;  %s1042_s21 = sld [smem:[#allocation19_spill]] }
  0x5e   : > { %p33_p13 = scmp.ge.s32.totalorder %s36_s12, 4   ;;  %s1043_s10 = sld [smem:[#allocation22_spill]] }
  0x5f   : > { %s1044_s1 = sld [smem:[#allocation20_spill]]  ;;  %s1046_s9 = smov %s785_s0 }
  0x60   : > { %s1045_s11 = sld [smem:[#allocation21_spill]]  ;;  %35 = sbr.rel (!%p33_p13) target bundleno = 17 (0x11), region = 96 }
  0x63   : > { %s1047_s0 = smov %s1042_s21 }
  0x65   :  { %401 = vsyncpa [#allocation6], 1 }
  0x66   :  { %403 = vsyncpa [#allocation6 + $0x1], 1 }
  0x67   :  { %404 = vsyncpa [#allocation7], 1 }
  0x68   :  { %406 = vsyncpa [#allocation7 + $0x1], 1 }
  0x69   :  { %407 = vsyncpa [#allocation9], 1 }
  0x6a   :  { %408 = vsyncpa [#allocation12], 1 }

</bundles_post_ra>
